<compile_context>
chip_gen: v5e
topology: v5e:2x2
jax: 0.10.0
libtpu: 0.0.40
codegen_flags: <defaults>
</compile_context>

<pallas_src>
import jax
import jax.numpy as jnp
from jax.experimental import pallas as pl
from jax.experimental.pallas import tpu as pltpu


_LANE = 128
_SMALL_C = 8                            # threshold for the VPU (non-MXU) path
_VMEM_LIVE_BUDGET = 16 * 1024 * 1024    # double-buffered in+out block bytes
_TARGET_STEP_BYTES = 2 * 1024 * 1024    # desired (in+out) HBM traffic per step
_VMEM_LIMIT_BYTES = 32 * 1024 * 1024    # safe on v5e / v6e / v7x


def _make_vpu_kernel(C):
    """z[:, o, :] = sum_k Winv[o, k] * x[:, k, :] -- scalar*vector on the VPU."""

    def kernel(winv_ref, x_ref, o_ref):
        # winv_ref: (C, C) float32 in SMEM; x_ref / o_ref: (nb, C, tn) in VMEM.
        xs = [x_ref[:, k, :].astype(jnp.float32) for k in range(C)]
        for o in range(C):
            acc = winv_ref[o, 0] * xs[0]
            for k in range(1, C):
                acc = acc + winv_ref[o, k] * xs[k]
            o_ref[:, o, :] = acc.astype(o_ref.dtype)

    return kernel


def _make_mxu_kernel(nb):
    """o[b] = Winv @ x[b] on the MXU (one (C,C)@(C,tn) matmul per batch row)."""

    def kernel(winv_ref, x_ref, o_ref):
        w = winv_ref[...]
        for b in range(nb):
            o_ref[b, :, :] = jnp.dot(
                w, x_ref[b, :, :].astype(jnp.float32),
                preferred_element_type=jnp.float32,
            ).astype(o_ref.dtype)

    return kernel


def _derive_tiling(B, C, HW, itemsize, max_nb):
    """Pick (nb, tn): lane-aligned pixel tile + batch elements per block."""
    # Live VMEM per lane column per batch element: (in + out) * double-buffer.
    per_lane_live = 4 * C * itemsize
    max_tn = max(_LANE, (_VMEM_LIVE_BUDGET // per_lane_live) // _LANE * _LANE)

    if HW <= _LANE:
        tn = HW                          # full-extent last dim is always legal
    else:
        # Lane-aligned tile; Pallas masks the ragged last pixel block.
        tn = min(max_tn, pl.cdiv(HW, _LANE) * _LANE)

    nb = 1
    if tn >= HW and B > 1:
        # One pixel tile covers the whole image: block the batch dimension to
        # amortise the fixed per-grid-step overhead.
        step_bytes = 2 * C * tn * itemsize
        want = max(1, _TARGET_STEP_BYTES // max(step_bytes, 1))
        vmem_cap = max(1, _VMEM_LIVE_BUDGET // (4 * C * tn * itemsize))
        nb = int(min(B, want, vmem_cap, max_nb))
        # Keep >= 2 grid steps so both v7x TensorCores / DMA streams engage.
        while nb > 1 and B // nb < 2:
            nb -= 1
        # Only the last two block dims may be ragged -> nb must divide B.
        while nb > 1 and B % nb != 0:
            nb -= 1
    return nb, tn


def inverse_1x1_conv(x_nchw: jax.Array, weight: jax.Array):
    """FrEIA `Inverse` of a 1x1 invertible conv: ((W^{-1} x,), -(H*W)*log|det W|)."""
    B, C, H, W = x_nchw.shape
    HW = H * W
    dtype = x_nchw.dtype
    itemsize = jnp.dtype(dtype).itemsize

    # Parameter prep in plain JAX (tiny).  W^{-1} stays float32 for accuracy.
    # TODO(synk): an LU/PLU parameterisation would be numerically safer for
    # ill-conditioned W; fine for Glow-style 1x1 convs.
    w_inv = jnp.linalg.inv(weight.astype(jnp.float32))
    _, logabsdet = jnp.linalg.slogdet(weight.astype(jnp.float32))
    # module(rev=True) returns -J; J = (H*W) * log|det W|
    log_jac = jnp.full((B,), -(H * W) * logabsdet, dtype=jnp.float32)

    use_vpu = C <= _SMALL_C
    nb, tn = _derive_tiling(
        B, C, HW, itemsize, max_nb=B if use_vpu else min(B, 16)
    )
    grid = (B // nb, pl.cdiv(HW, tn))

    if use_vpu:
        kernel = _make_vpu_kernel(C)
        # Tiny scalar table: whole W^{-1} lives in SMEM, read as scalars.
        winv_spec = pl.BlockSpec(memory_space=pltpu.MemorySpace.SMEM)
    else:
        kernel = _make_mxu_kernel(nb)
        # Same resident VMEM block every step.
        winv_spec = pl.BlockSpec((C, C), lambda b, j: (0, 0))

    # Pure view: NCHW is already row-major (B, C, H*W).  No transpose, no pad.
    x_bchw = x_nchw.reshape(B, C, HW)

    cost = pl.CostEstimate(
        flops=2 * B * HW * C * C,
        transcendentals=0,
        bytes_accessed=2 * B * C * HW * itemsize + C * C * 4,
    )

    z_bchw = pl.pallas_call(
        kernel,
        out_shape=jax.ShapeDtypeStruct((B, C, HW), dtype),
        grid_spec=pltpu.PrefetchScalarGridSpec(
            num_scalar_prefetch=0,
            grid=grid,
            in_specs=[
                winv_spec,
                pl.BlockSpec((nb, C, tn), lambda b, j: (b, 0, j)),
            ],
            out_specs=pl.BlockSpec((nb, C, tn), lambda b, j: (b, 0, j)),
        ),
        compiler_params=pltpu.CompilerParams(
            dimension_semantics=("parallel", "parallel"),
            vmem_limit_bytes=_VMEM_LIMIT_BYTES,
        ),
        cost_estimate=cost,
    )(w_inv, x_bchw)

    # Pure view back to NCHW.
    return (z_bchw.reshape(B, C, H, W),), log_jac


if __name__ == "__main__":
    key = jax.random.PRNGKey(0)

    def run_case(B, C, H, W):
        kx, kw = jax.random.split(jax.random.fold_in(key, B * 1000 + C * 100 + H))
        x = jax.random.normal(kx, (B, C, H, W), dtype=jnp.float32)
        weight = jnp.eye(C, dtype=jnp.float32) + 0.1 * jax.random.normal(
            kw, (C, C), dtype=jnp.float32
        )

        (z,), log_jac = jax.jit(inverse_1x1_conv)(x, weight)
        jax.block_until_ready(z)
        jax.block_until_ready(log_jac)

        # Reference: inverse transform in plain JAX.
        w_inv = jnp.linalg.inv(weight)
        z_ref = jnp.einsum("oc,bchw->bohw", w_inv, x)
        assert z.shape == (B, C, H, W)
        assert log_jac.shape == (B,)
        assert jnp.allclose(z, z_ref, atol=1e-5, rtol=1e-5)

        # Jacobian convention: Inverse.forward returns -(H*W)*log|det W|.
        _, logabsdet = jnp.linalg.slogdet(weight)
        assert jnp.allclose(log_jac, jnp.full((B,), -(H * W) * logabsdet), atol=1e-4)

        # Invertibility sanity: applying the forward (W) transform recovers x.
        x_rec = jnp.einsum("oc,bchw->bohw", weight, z)
        assert jnp.allclose(x_rec, x, atol=1e-4, rtol=1e-4)

    # Canonical small shape for the module: small-C VPU path.
    run_case(2, 4, 16, 16)
    # Ragged last pixel tile (HW not a multiple of 128), still the VPU path.
    run_case(2, 4, 20, 20)
    # MXU path (C above the small-C threshold).
    run_case(2, 16, 16, 16)

    print("KERNEL_OK")
</pallas_src>

<mosaic_0001>
module attributes {stable_mosaic.version = 11 : i64} {
  func.func @kernel(%arg0: i32, %arg1: i32, %arg2: memref<4x4xf32, #tpu.memory_space<smem>>, %arg3: memref<1x4x256xf32, #tpu.memory_space<vmem>>, %arg4: memref<1x4x256xf32, #tpu.memory_space<vmem>>) attributes {dimension_semantics = [#tpu.dimension_semantics<parallel>, #tpu.dimension_semantics<parallel>], iteration_bounds = array<i64: 2, 1>, scalar_prefetch = 0 : i64, scratch_operands = 0 : i64, tpu.core_type = #tpu.core_type<tc>, window_params = [{transform_indices = @transform_0, window_bounds = array<i64: 4, 4>}, {transform_indices = @transform_1, window_bounds = array<i64: 1, 4, 256>}, {transform_indices = @transform_2, window_bounds = array<i64: 1, 4, 256>}]} {
    %c0 = arith.constant 0 : index
    %c0_0 = arith.constant 0 : index
    %c0_1 = arith.constant 0 : index
    %0 = vector.load %arg3[%c0, %c0_0, %c0_1] : memref<1x4x256xf32, #tpu.memory_space<vmem>>, vector<1x1x256xf32>
    %1 = vector.shape_cast %0 : vector<1x1x256xf32> to vector<1x256xf32>
    %c0_2 = arith.constant 0 : index
    %c1 = arith.constant 1 : index
    %c0_3 = arith.constant 0 : index
    %2 = vector.load %arg3[%c0_2, %c1, %c0_3] : memref<1x4x256xf32, #tpu.memory_space<vmem>>, vector<1x1x256xf32>
    %3 = vector.shape_cast %2 : vector<1x1x256xf32> to vector<1x256xf32>
    %c0_4 = arith.constant 0 : index
    %c2 = arith.constant 2 : index
    %c0_5 = arith.constant 0 : index
    %4 = vector.load %arg3[%c0_4, %c2, %c0_5] : memref<1x4x256xf32, #tpu.memory_space<vmem>>, vector<1x1x256xf32>
    %5 = vector.shape_cast %4 : vector<1x1x256xf32> to vector<1x256xf32>
    %c0_6 = arith.constant 0 : index
    %c3 = arith.constant 3 : index
    %c0_7 = arith.constant 0 : index
    %6 = vector.load %arg3[%c0_6, %c3, %c0_7] : memref<1x4x256xf32, #tpu.memory_space<vmem>>, vector<1x1x256xf32>
    %7 = vector.shape_cast %6 : vector<1x1x256xf32> to vector<1x256xf32>
    %c0_8 = arith.constant 0 : index
    %c0_9 = arith.constant 0 : index
    %8 = memref.load %arg2[%c0_8, %c0_9] : memref<4x4xf32, #tpu.memory_space<smem>>
    %9 = vector.broadcast %8 : f32 to vector<1x256xf32>
    %10 = arith.mulf %9, %1 : vector<1x256xf32>
    %c0_10 = arith.constant 0 : index
    %c1_11 = arith.constant 1 : index
    %11 = memref.load %arg2[%c0_10, %c1_11] : memref<4x4xf32, #tpu.memory_space<smem>>
    %12 = vector.broadcast %11 : f32 to vector<1x256xf32>
    %13 = arith.mulf %12, %3 : vector<1x256xf32>
    %14 = arith.addf %10, %13 : vector<1x256xf32>
    %c0_12 = arith.constant 0 : index
    %c2_13 = arith.constant 2 : index
    %15 = memref.load %arg2[%c0_12, %c2_13] : memref<4x4xf32, #tpu.memory_space<smem>>
    %16 = vector.broadcast %15 : f32 to vector<1x256xf32>
    %17 = arith.mulf %16, %5 : vector<1x256xf32>
    %18 = arith.addf %14, %17 : vector<1x256xf32>
    %c0_14 = arith.constant 0 : index
    %c3_15 = arith.constant 3 : index
    %19 = memref.load %arg2[%c0_14, %c3_15] : memref<4x4xf32, #tpu.memory_space<smem>>
    %20 = vector.broadcast %19 : f32 to vector<1x256xf32>
    %21 = arith.mulf %20, %7 : vector<1x256xf32>
    %22 = arith.addf %18, %21 : vector<1x256xf32>
    %c0_16 = arith.constant 0 : index
    %c0_17 = arith.constant 0 : index
    %c0_18 = arith.constant 0 : index
    %23 = vector.load %arg4[%c0_16, %c0_17, %c0_18] : memref<1x4x256xf32, #tpu.memory_space<vmem>>, vector<1x1x256xf32>
    %24 = vector.shape_cast %23 : vector<1x1x256xf32> to vector<1x256xf32>
    %25 = vector.shape_cast %22 : vector<1x256xf32> to vector<1x1x256xf32>
    tpu.vector_store %arg4[%c0_16, %c0_17, %c0_18], %25 {strides = array<i32>} : memref<1x4x256xf32, #tpu.memory_space<vmem>>, vector<1x1x256xf32>,
    %c1_19 = arith.constant 1 : index
    %c0_20 = arith.constant 0 : index
    %26 = memref.load %arg2[%c1_19, %c0_20] : memref<4x4xf32, #tpu.memory_space<smem>>
    %27 = vector.broadcast %26 : f32 to vector<1x256xf32>
    %28 = arith.mulf %27, %1 : vector<1x256xf32>
    %c1_21 = arith.constant 1 : index
    %c1_22 = arith.constant 1 : index
    %29 = memref.load %arg2[%c1_21, %c1_22] : memref<4x4xf32, #tpu.memory_space<smem>>
    %30 = vector.broadcast %29 : f32 to vector<1x256xf32>
    %31 = arith.mulf %30, %3 : vector<1x256xf32>
    %32 = arith.addf %28, %31 : vector<1x256xf32>
    %c1_23 = arith.constant 1 : index
    %c2_24 = arith.constant 2 : index
    %33 = memref.load %arg2[%c1_23, %c2_24] : memref<4x4xf32, #tpu.memory_space<smem>>
    %34 = vector.broadcast %33 : f32 to vector<1x256xf32>
    %35 = arith.mulf %34, %5 : vector<1x256xf32>
    %36 = arith.addf %32, %35 : vector<1x256xf32>
    %c1_25 = arith.constant 1 : index
    %c3_26 = arith.constant 3 : index
    %37 = memref.load %arg2[%c1_25, %c3_26] : memref<4x4xf32, #tpu.memory_space<smem>>
    %38 = vector.broadcast %37 : f32 to vector<1x256xf32>
    %39 = arith.mulf %38, %7 : vector<1x256xf32>
    %40 = arith.addf %36, %39 : vector<1x256xf32>
    %c0_27 = arith.constant 0 : index
    %c1_28 = arith.constant 1 : index
    %c0_29 = arith.constant 0 : index
    %41 = vector.load %arg4[%c0_27, %c1_28, %c0_29] : memref<1x4x256xf32, #tpu.memory_space<vmem>>, vector<1x1x256xf32>
    %42 = vector.shape_cast %41 : vector<1x1x256xf32> to vector<1x256xf32>
    %43 = vector.shape_cast %40 : vector<1x256xf32> to vector<1x1x256xf32>
    tpu.vector_store %arg4[%c0_27, %c1_28, %c0_29], %43 {strides = array<i32>} : memref<1x4x256xf32, #tpu.memory_space<vmem>>, vector<1x1x256xf32>,
    %c2_30 = arith.constant 2 : index
    %c0_31 = arith.constant 0 : index
    %44 = memref.load %arg2[%c2_30, %c0_31] : memref<4x4xf32, #tpu.memory_space<smem>>
    %45 = vector.broadcast %44 : f32 to vector<1x256xf32>
    %46 = arith.mulf %45, %1 : vector<1x256xf32>
    %c2_32 = arith.constant 2 : index
    %c1_33 = arith.constant 1 : index
    %47 = memref.load %arg2[%c2_32, %c1_33] : memref<4x4xf32, #tpu.memory_space<smem>>
    %48 = vector.broadcast %47 : f32 to vector<1x256xf32>
    %49 = arith.mulf %48, %3 : vector<1x256xf32>
    %50 = arith.addf %46, %49 : vector<1x256xf32>
    %c2_34 = arith.constant 2 : index
    %c2_35 = arith.constant 2 : index
    %51 = memref.load %arg2[%c2_34, %c2_35] : memref<4x4xf32, #tpu.memory_space<smem>>
    %52 = vector.broadcast %51 : f32 to vector<1x256xf32>
    %53 = arith.mulf %52, %5 : vector<1x256xf32>
    %54 = arith.addf %50, %53 : vector<1x256xf32>
    %c2_36 = arith.constant 2 : index
    %c3_37 = arith.constant 3 : index
    %55 = memref.load %arg2[%c2_36, %c3_37] : memref<4x4xf32, #tpu.memory_space<smem>>
    %56 = vector.broadcast %55 : f32 to vector<1x256xf32>
    %57 = arith.mulf %56, %7 : vector<1x256xf32>
    %58 = arith.addf %54, %57 : vector<1x256xf32>
    %c0_38 = arith.constant 0 : index
    %c2_39 = arith.constant 2 : index
    %c0_40 = arith.constant 0 : index
    %59 = vector.load %arg4[%c0_38, %c2_39, %c0_40] : memref<1x4x256xf32, #tpu.memory_space<vmem>>, vector<1x1x256xf32>
    %60 = vector.shape_cast %59 : vector<1x1x256xf32> to vector<1x256xf32>
    %61 = vector.shape_cast %58 : vector<1x256xf32> to vector<1x1x256xf32>
    tpu.vector_store %arg4[%c0_38, %c2_39, %c0_40], %61 {strides = array<i32>} : memref<1x4x256xf32, #tpu.memory_space<vmem>>, vector<1x1x256xf32>,
    %c3_41 = arith.constant 3 : index
    %c0_42 = arith.constant 0 : index
    %62 = memref.load %arg2[%c3_41, %c0_42] : memref<4x4xf32, #tpu.memory_space<smem>>
    %63 = vector.broadcast %62 : f32 to vector<1x256xf32>
    %64 = arith.mulf %63, %1 : vector<1x256xf32>
    %c3_43 = arith.constant 3 : index
    %c1_44 = arith.constant 1 : index
    %65 = memref.load %arg2[%c3_43, %c1_44] : memref<4x4xf32, #tpu.memory_space<smem>>
    %66 = vector.broadcast %65 : f32 to vector<1x256xf32>
    %67 = arith.mulf %66, %3 : vector<1x256xf32>
    %68 = arith.addf %64, %67 : vector<1x256xf32>
    %c3_45 = arith.constant 3 : index
    %c2_46 = arith.constant 2 : index
    %69 = memref.load %arg2[%c3_45, %c2_46] : memref<4x4xf32, #tpu.memory_space<smem>>
    %70 = vector.broadcast %69 : f32 to vector<1x256xf32>
    %71 = arith.mulf %70, %5 : vector<1x256xf32>
    %72 = arith.addf %68, %71 : vector<1x256xf32>
    %c3_47 = arith.constant 3 : index
    %c3_48 = arith.constant 3 : index
    %73 = memref.load %arg2[%c3_47, %c3_48] : memref<4x4xf32, #tpu.memory_space<smem>>
    %74 = vector.broadcast %73 : f32 to vector<1x256xf32>
    %75 = arith.mulf %74, %7 : vector<1x256xf32>
    %76 = arith.addf %72, %75 : vector<1x256xf32>
    %c0_49 = arith.constant 0 : index
    %c3_50 = arith.constant 3 : index
    %c0_51 = arith.constant 0 : index
    %77 = vector.load %arg4[%c0_49, %c3_50, %c0_51] : memref<1x4x256xf32, #tpu.memory_space<vmem>>, vector<1x1x256xf32>
    %78 = vector.shape_cast %77 : vector<1x1x256xf32> to vector<1x256xf32>
    %79 = vector.shape_cast %76 : vector<1x256xf32> to vector<1x1x256xf32>
    tpu.vector_store %arg4[%c0_49, %c3_50, %c0_51], %79 {strides = array<i32>} : memref<1x4x256xf32, #tpu.memory_space<vmem>>, vector<1x1x256xf32>,
    return
  }
  func.func @transform_0(%arg0: i32, %arg1: i32) -> (i32, i32) {
    %c0_i32 = arith.constant 0 : i32
    %c0_i32_0 = arith.constant 0 : i32
    %c0_i32_1 = arith.constant 0 : i32
    return %c0_i32, %c0_i32_0 : i32, i32
  }
  func.func @transform_1(%arg0: i32, %arg1: i32) -> (i32, i32, i32) {
    %c0_i32 = arith.constant 0 : i32
    %c0_i32_0 = arith.constant 0 : i32
    return %arg0, %c0_i32, %arg1 : i32, i32, i32
  }
  func.func @transform_2(%arg0: i32, %arg1: i32) -> (i32, i32, i32) {
    %c0_i32 = arith.constant 0 : i32
    %c0_i32_0 = arith.constant 0 : i32
    return %arg0, %c0_i32, %arg1 : i32, i32, i32
  }
}

</mosaic_0001>

<bundles_post_ra>
// kernel: custom-call.13
= control target key start
LH: loop header
LB: loop body
LE: loop exit
PB: predicated region body
PF: predicated region fallthrough
CT: control target
= control target key end

     0   :  { %5 = vsyncpa [#allocation2], 0  ;;  %s558_s0 = inlined_call_operand.hbm [shape: f32[4,4], index: 0, kind: input, shape index: {}]   ;;  %s559_s1 = inlined_call_operand.vmem [shape: f32[4,4], index: 1, kind: output, shape index: {0}]   ;;  %s560_s2 = inlined_call_operand.hbm [shape: s32[4], index: 2, kind: output, shape index: {1}]   ;;  %s561_s3 = inlined_call_operand.vmem [shape: s32[4], index: 3, kind: output, shape index: {2}]  }
   0x1   :  { %6 = vsyncpa [#allocation3], 0  ;;  %s10_s14 = sshll.u32 %s558_s0, 4  ;;  %s483_s15 = smov [#allocation1]   ;;  %s11_s14 = int_to_ptr.hbm [resolvable:$true] %s10_s14 }
   0x2   :  { %s12_s16 = sshll.u32 %s483_s15, 4  ;;  %s13_s16 = int_to_ptr.vmem [resolvable:$true] %s12_s16 }
   0x3   :  { %15 = dma.hbm_to_vmem [thread:$0]  %s11_s14, 64, %s13_s16, [#allocation2]  }
   0x4   :  { %475 = dma.done.wait [#allocation2], 64  }
   0x5   :  { %476 = vsyncadd [#allocation2], 4294967232  ;;  %v25_v0 = vlaneseq  ;;  %v484_v1 = vmov 0   ;;  %v20_v3 = vld [vmem:[#allocation1] sm:$0xf]  ;;  %s513_s0 = smov 0  }
   0x6   :  { %24 = vst [vmem:[#allocation6] sm:$0x1] %v484_v1 }
   0x7   :  { %v510_v2 = vshrl.u32 %v25_v0, 7  ;;  %21 = vst [vmem:[#allocation0] sm:$0xf] %v20_v3 }
   0x9   :  { %29 = vst [vmem:[#allocation10] sm:$0xff] %v510_v2 }
   0xe   :  { %v22_v4 = vld [vmem:[#allocation0] sm:$0xff] }
   0xf   :  { %23 = vst [vmem:[#allocation4] sm:$0xff] %v22_v4 }
  0x10 LB: > { %vm45_vm0 = vcmp.lt.s32.totalorder %v510_v2, 4  ;;  %v520_v7 = vstv %s481_s0  ;;  %s86_s17 = ssub.s32 128, %s481_s0  ;;  %v92_v38 = vand.u32 127, %v25_v0  ;;  %s98_s18 = scalar_lea.vmem [#allocation4], %s481_s0  ;;  %v95_v41 = vld [vmem:[#allocation6] ss:$0 sm:$0xff]  ;;  %s481_s0 = sphi %s513_s0, %s35_s0  }
  0x11   : > { %vm44_vm1 = vcmp.ge.s32.totalorder %v510_v2, %v520_v7  ;;  %s104_s21 = scalar_lea.vmem [#allocation10], %s481_s0  ;;  %vm124_vm14 = vcmp.gt.s32.totalorder %v510_v2, %v520_v7  ;;  %s35_s0 = sadd.s32 1, %s481_s0  }
  0x12   : > { %vm46_vm3 = vmand %vm44_vm1, %vm45_vm0  ;;  %vm93_vm12 = vcmp.eq.s32.totalorder %v92_v38, %v520_v7  ;;  %v106_v43 = vld [vmem:[%s104_s21] ss:$0 sm:$0xff]  ;;  %p32_p0 = scmp.ge.s32.totalorder %s35_s0, 4  }
  0x13   :  { %s485_s23 = smov (%p32_p0), [#allocation7]   ;;  %s278_s27 = sshll.u32 (%p32_p0), %s560_s2, 4  ;;  %s279_s27 = int_to_ptr.hbm [resolvable:$true] %s278_s27 }
  0x14   :  { %s276_s24 = sshll.u32 (%p32_p0), %s485_s23, 4  ;;  %s277_s24 = int_to_ptr.vmem [resolvable:$true] %s276_s24 }
  0x16   : > { %v40_v5 = vld [vmem:[#allocation4] sm:$0xff]  ;;  %v100_v39 = vld [vmem:[%s98_s18] ss:$0 sm:$0xff] }
  0x17   : > { %v41_v6 = vand.u32 2147483647, %v40_v5 }
  0x19   : > { %vm401_vm2 = vcmp.gt.f32.partialorder %v41_v6, -inf }
  0x1a   : > { %vm48_vm4 = vmand %vm46_vm3, %vm401_vm2 }
  0x1b   : > { %v49_v8 = vsel %vm48_vm4, %v510_v2, %v520_v7  ;;  %v50_v9 = vsel %vm48_vm4, %v41_v6, -inf  ;;  %vm141_vm4 = vmand %vm124_vm14, %vm93_vm12 }
  0x1c   : > { %v51_v10 = vrot.slane %v50_v9, 1  ;;  %v52_v11 = vrot.slane %v49_v8, 1 }
  0x1e   : > { %vm53_vm5 = vcmp.ge.f32.partialorder %v51_v10, %v50_v9  ;;  %v56_v12 = vrot.slane %v51_v10, 1  ;;  %v57_v13 = vrot.slane %v52_v11, 1 }
  0x1f   : > { %v54_v14 = vsel %vm53_vm5, %v51_v10, %v50_v9  ;;  %v55_v15 = vsel %vm53_vm5, %v52_v11, %v49_v8  ;;  %vm116_vm5 = vcmp.gt.s32.totalorder %v92_v38, %v520_v7 }
  0x20   : > { %vm58_vm6 = vcmp.ge.f32.partialorder %v56_v12, %v54_v14  ;;  %v61_v16 = vrot.slane %v56_v12, 1  ;;  %v62_v17 = vrot.slane %v57_v13, 1 }
  0x21   : > { %v59_v18 = vsel %vm58_vm6, %v56_v12, %v54_v14  ;;  %v60_v19 = vsel %vm58_vm6, %v57_v13, %v55_v15 }
  0x22   : > { %vm63_vm7 = vcmp.ge.f32.partialorder %v61_v16, %v59_v18  ;;  %v66_v20 = vrot.slane %v61_v16, 1  ;;  %v67_v21 = vrot.slane %v62_v17, 1 }
  0x23   : > { %v64_v22 = vsel %vm63_vm7, %v61_v16, %v59_v18  ;;  %v65_v23 = vsel %vm63_vm7, %v62_v17, %v60_v19 }
  0x24   : > { %vm68_vm8 = vcmp.ge.f32.partialorder %v66_v20, %v64_v22  ;;  %v71_v24 = vrot.slane %v66_v20, 1  ;;  %v72_v25 = vrot.slane %v67_v21, 1 }
  0x25   : > { %v69_v26 = vsel %vm68_vm8, %v66_v20, %v64_v22  ;;  %v70_v27 = vsel %vm68_vm8, %v67_v21, %v65_v23 }
  0x26   : > { %vm73_vm9 = vcmp.ge.f32.partialorder %v71_v24, %v69_v26  ;;  %v76_v28 = vrot.slane %v71_v24, 1  ;;  %v77_v29 = vrot.slane %v72_v25, 1 }
  0x27   : > { %v74_v30 = vsel %vm73_vm9, %v71_v24, %v69_v26  ;;  %v75_v31 = vsel %vm73_vm9, %v72_v25, %v70_v27 }
  0x28   : > { %vm78_vm10 = vcmp.ge.f32.partialorder %v76_v28, %v74_v30  ;;  %v81_v32 = vrot.slane %v76_v28, 1  ;;  %v82_v33 = vrot.slane %v77_v29, 1 }
  0x29   : > { %v79_v34 = vsel %vm78_vm10, %v76_v28, %v74_v30  ;;  %v80_v35 = vsel %vm78_vm10, %v77_v29, %v75_v31 }
  0x2a   : > { %vm83_vm11 = vcmp.ge.f32.partialorder %v81_v32, %v79_v34 }
  0x2b   : > { %v85_v36 = vsel %vm83_vm11, %v82_v33, %v80_v35 }
  0x2c   : > { %87 = vrot.lane.b32.xlu0 %v85_v36, %s86_s17 }
  0x9e   : > { %v88_v37 = vpop.permute.xlu0 %87 }
  0x9f   : > { %408 = vpush %v88_v37 }
  0xd0   : > { %s409_s19 = spop %408 }
  0xd1   : > { %v94_v40 = vstv %s409_s19  ;;  %s99_s20 = scalar_lea.vmem [#allocation4], %s409_s19  ;;  %s105_s22 = scalar_lea.vmem [#allocation10], %s409_s19 }
  0xd2   : > { %v101_v42 = vld [vmem:[%s99_s20] ss:$0 sm:$0xff]  ;;  %v96_v45 = vsel %vm93_vm12, %v94_v40, %v95_v41 }
  0xd3   : > { %v107_v44 = vld [vmem:[%s105_s22] ss:$0 sm:$0xff]  ;;  %102 = vst [vmem:[%s99_s20] sm:$0x1] %v100_v39  ;;  %vm110_vm13 = vcmp.ne.f32.partialorder %v101_v42, 0.0  ;;  %v117_v61 = vsel %vm116_vm5, %v101_v42, 0.0 }
  0xd4   : > { %103 = vst [vmem:[%s98_s18] sm:$0x1] %v101_v42  ;;  %vm111_vm15 = vmand %vm93_vm12, %vm110_vm13 }
  0xd5   : > { %108 = vst [vmem:[%s105_s22] sm:$0x1] %v106_v43  ;;  %v112_v46 = vsel %vm111_vm15, %v101_v42, 1.0 }
  0xd6   : > { %109 = vst [vmem:[%s104_s21] sm:$0x1] %v107_v44  ;;  %v125_v47 = vsel %vm124_vm14, %v112_v46, 1.0 }
  0xd7   : > { %421 = vrcp.f32 %v125_v47  ;;  %97 = vst [vmem:[#allocation6] sm:$0x1] %v96_v45  ;;  %v137_v51 = vand.u32 2147483648, %v125_v47  ;;  %v135_v53 = vand.u32 2147483647, %v125_v47  ;;  %vm131_vm1 = vweird.f32 %v125_v47 }
  0xd9   : > { %v138_v55 = vor.u32 1.1754944e-38, %v137_v51  ;;  %vm136_vm3 = vcmp.eq.f32.partialorder %v135_v53, 8.507059e+37 }
  0xdb   : > { %v121_v57 = vld [vmem:[#allocation4] sm:$0xff] }
  0xdd   : > { %v422_v48 = vpop.eup %421  ;;  %v148_v3 = vld [vmem:[#allocation10] sm:$0xff] (%p32_p0) }
  0xde   : > { %v127_v49 = vmul.f32 %v422_v48, %v125_v47  ;;  %vm132_vm0 = vweird.f32 %v422_v48  ;;  %v205_v5 = vld [vmem:[#allocation6] sm:$0x1] (%p32_p0) }
  0xdf   : > { %vm133_vm2 = vmor %vm131_vm1, %vm132_vm0  ;;  %208 = vst [vmem:[#allocation7] sm:$0x1] (%p32_p0), %v205_v5 }
  0xe0   : > { %v128_v50 = vsub.f32 1.0, %v127_v49  ;;  %281 = dma.vmem_to_hbm [thread:$0]  (%p32_p0), %s277_s24, 16, %s279_s27, [#allocation3]  }
  0xe2   : > { %v129_v52 = vmul.f32 %v422_v48, %v128_v50 }
  0xe4   : > { %v130_v54 = vadd.f32 %v422_v48, %v129_v52 }
  0xe6   : > { %v134_v56 = vsel %vm133_vm2, %v422_v48, %v130_v54 }
  0xe7   : > { %v139_v58 = vsel %vm136_vm3, %v138_v55, %v134_v56 }
  0xe8   : > { %v140_v59 = vmul.f32 %v139_v58, %v121_v57 }
  0xea   : > { %v142_v60 = vsel %vm141_vm4, %v140_v59, 0.0 }
  0xeb   : > { %143 = vadd.xlane.f32.xlu0 %v142_v60 }
 0x114   :  { %164 = vxpose.xlu0.b32.start.end [1/1] (short) (narrow) (%p32_p0), %v148_v3, 8 }
 0x15e   : > { %v144_v62 = vpop.xlane.xlu0 %143 }
 0x15f   : > { %v145_v63 = vmul.f32 %v144_v62, %v117_v61  ;;  %34 = sbr.rel (!%p32_p0) target bundleno = 16 (0x10), region = 112 }
 0x161   : > { %v146_v1 = vsub.f32 %v140_v59, %v145_v63 }
 0x163   : > { %147 = vst [vmem:[#allocation4] sm:$0xff] %v146_v1 }
 0x16a   :  { %v199_v4 = vld [vmem:[#allocation4] sm:$0xf] }
 0x16b   :  { %202 = vst [vmem:[#allocation5] sm:$0xf] %v199_v4 }
 0x172   :  { %v269_v6 = vld [vmem:[#allocation5] sm:$0xf] }
 0x173   :  { %270 = vst [vmem:[%s559_s1] sm:$0xf] %v269_v6 }
 0x1b8   :  { %v180_v0 = vpop.trf.xlu0 }
 0x1b9   :  { %196 = vst [vmem:[#allocation8] sm:$0x1] %v180_v0 }
 0x1c0   :  { %v211_v2 = vld [vmem:[#allocation8] sm:$0x1] }
 0x1c1   :  { %214 = vst [vmem:[#allocation9] sm:$0x1] %v211_v2 }
 0x1c8   :  { %v338_v7 = vld [vmem:[#allocation9] sm:$0x1] }
 0x1c9   :  { %339 = vst [vmem:[%s561_s3] sm:$0x1] %v338_v7 }
 0x1ca   :  { %477 = dma.done.wait [#allocation3], 16  }
 0x1cb   :  { %478 = vsyncadd [#allocation3], 4294967280 }
 0x1cc   :  { %346 = vsyncpa [#allocation2], 1 }
 0x1cd   :  { %347 = vsyncpa [#allocation3], 1 }

// kernel: custom-call.9
= control target key start
LH: loop header
LB: loop body
LE: loop exit
PB: predicated region body
PF: predicated region fallthrough
CT: control target
= control target key end

     0   :  { %v39_v1 = vlaneseq  ;;  %v177_v20 = vmov -1.0   ;;  %s196_s0 = inlined_call_operand.vmem [shape: f32[1,4,4], index: 0, kind: input, shape index: {}]   ;;  %s197_s1 = inlined_call_operand.vmem [shape: f32[1,4,4], index: 1, kind: output, shape index: {}]  }
   0x1   :  { %v18_v0 = vld [vmem:[%s196_s0] sm:$0xf] }
   0x2   :  { %19 = vst [vmem:[#allocation1] sm:$0xf] %v18_v0  ;;  %v40_v3 = vand.u32 127, %v39_v1  ;;  %v43_v4 = vshrl.u32 %v39_v1, 7 }
   0x4   :  { %vm45_vm0 = vcmp.eq.s32.totalorder %v43_v4, %v40_v3  ;;  %vm41_vm1 = vcmp.lt.s32.totalorder %v40_v3, 4  ;;  %vm50_vm2 = vcmp.le.s32.totalorder %v43_v4, %v40_v3  ;;  %vm77_vm8 = vcmp.eq.s32.totalorder %v40_v3, 3 }
   0x5   :  { %vm51_vm3 = vmand %vm50_vm2, %vm41_vm1  ;;  %vm74_vm9 = vcmp.eq.s32.totalorder %v40_v3, %v43_v4  ;;  %v78_v21 = vsel %vm77_vm8, 1.0, %v177_v20  ;;  %vm85_vm10 = vcmp.eq.s32.totalorder %v40_v3, 2  ;;  %vm95_vm11 = vcmp.eq.s32.totalorder %v40_v3, 1 }
   0x6   :  { %v79_v22 = vsel %vm74_vm9, %v78_v21, 0.0  ;;  %vm104_vm12 = vcmp.eq.s32.totalorder %v40_v3, 0 }
   0x9   :  { %v37_v2 = vld [vmem:[#allocation1] sm:$0xf] }
   0xa   :  { %38 = vst [vmem:[#allocation0] sm:$0xf] %v37_v2 }
  0x11   :  { %v46_v5 = vld [vmem:[#allocation0] sm:$0xff] }
  0x12   :  { %v47_v6 = vsel %vm45_vm0, %v46_v5, 0.0  ;;  %v52_v15 = vsel %vm51_vm3, %v46_v5, 0.0 }
  0x13   :  { %48 = vadd.xlane.f32.xlu0 %v47_v6 }
  0x86   :  { %v49_v7 = vpop.xlane.xlu0 %48 }
  0x87   :  { %175 = vrcp.f32 %v49_v7  ;;  %v64_v11 = vand.u32 2147483648, %v49_v7  ;;  %v62_v13 = vand.u32 2147483647, %v49_v7  ;;  %vm58_vm5 = vweird.f32 %v49_v7 }
  0x89   :  { %v65_v16 = vor.u32 1.1754944e-38, %v64_v11  ;;  %vm63_vm7 = vcmp.eq.f32.partialorder %v62_v13, 8.507059e+37 }
  0x8d   :  { %v176_v8 = vpop.eup %175 }
  0x8e   :  { %v54_v9 = vmul.f32 %v176_v8, %v49_v7  ;;  %vm59_vm4 = vweird.f32 %v176_v8 }
  0x8f   :  { %vm60_vm6 = vmor %vm58_vm5, %vm59_vm4 }
  0x90   :  { %v55_v10 = vsub.f32 1.0, %v54_v9 }
  0x92   :  { %v56_v12 = vmul.f32 %v176_v8, %v55_v10 }
  0x94   :  { %v57_v14 = vadd.f32 %v176_v8, %v56_v12 }
  0x96   :  { %v61_v17 = vsel %vm60_vm6, %v176_v8, %v57_v14 }
  0x97   :  { %v66_v18 = vsel %vm63_vm7, %v65_v16, %v61_v17 }
  0x98   :  { %v67_v19 = vmul.f32 %v66_v18, %v52_v15 }
  0x9a   :  { %68 = vst [vmem:[#allocation4] sm:$0xff] %v67_v19 }
  0xa1   :  { %v81_v23 = vld [vmem:[#allocation4 + $0x2] ss:$0 sm:$0xff]  ;;  %v91_v26 = vld [vmem:[#allocation4 + $0x1] ss:$0 sm:$0xff]  ;;  %v100_v31 = vld [vmem:[#allocation4] ss:$0 sm:$0xff] }
  0xa2   :  { %v82_v24 = vxor.u32 2147483648, %v81_v23  ;;  %v92_v28 = vxor.u32 2147483648, %v91_v26  ;;  %v101_v33 = vxor.u32 2147483648, %v100_v31 }
  0xa4   :  { %v86_v25 = vmul.f32 %v82_v24, %v79_v22 }
  0xa6   :  { %87 = vadd.xlane.f32.xlu0 %v86_v25 }
 0x119   :  { %v88_v27 = vpop.xlane.xlu0 %87 }
 0x11a   :  { %v89_v29 = vsel %vm85_vm10, %v88_v27, %v79_v22 }
 0x11b   :  { %v96_v30 = vmul.f32 %v92_v28, %v89_v29 }
 0x11d   :  { %97 = vadd.xlane.f32.xlu1 %v96_v30 }
 0x190   :  { %v98_v32 = vpop.xlane.xlu1 %97 }
 0x191   :  { %v99_v34 = vsel %vm95_vm11, %v98_v32, %v89_v29 }
 0x192   :  { %v105_v35 = vmul.f32 %v101_v33, %v99_v34 }
 0x194   :  { %106 = vadd.xlane.f32.xlu1 %v105_v35 }
 0x207   :  { %v107_v36 = vpop.xlane.xlu1 %106 }
 0x208   :  { %v108_v37 = vsel %vm104_vm12, %v107_v36, %v99_v34 }
 0x209   :  { %v123_v38 = vmul.f32 %v108_v37, %v66_v18 }
 0x20b   :  { %v125_v39 = vsel %vm58_vm5, %v108_v37, %v123_v38 }
 0x20c   :  { %126 = vst [vmem:[#allocation2] sm:$0xff] %v125_v39 }
 0x213   :  { %v129_v40 = vld [vmem:[#allocation2] sm:$0xf] }
 0x214   :  { %132 = vst [vmem:[#allocation3] sm:$0xf] %v129_v40 }
 0x21b   :  { %v149_v41 = vld [vmem:[#allocation3] sm:$0xf] }
 0x21c   :  { %150 = vst [vmem:[%s197_s1] sm:$0xf] %v149_v41 }

// kernel: custom-call.10
= control target key start
LH: loop header
LB: loop body
LE: loop exit
PB: predicated region body
PF: predicated region fallthrough
CT: control target
= control target key end

     0   :  { %v39_v1 = vlaneseq  ;;  %v178_v20 = vmov -1.0   ;;  %s197_s0 = inlined_call_operand.vmem [shape: f32[1,4,4], index: 0, kind: input, shape index: {}]   ;;  %s198_s1 = inlined_call_operand.vmem [shape: f32[1,4,4], index: 1, kind: output, shape index: {}]  }
   0x1   :  { %v18_v0 = vld [vmem:[%s197_s0] sm:$0xf] }
   0x2   :  { %19 = vst [vmem:[#allocation1] sm:$0xf] %v18_v0  ;;  %v40_v3 = vand.u32 127, %v39_v1  ;;  %v43_v4 = vshrl.u32 %v39_v1, 7 }
   0x4   :  { %vm45_vm0 = vcmp.eq.s32.totalorder %v43_v4, %v40_v3  ;;  %vm41_vm1 = vcmp.lt.s32.totalorder %v40_v3, 4  ;;  %vm50_vm2 = vcmp.ge.s32.totalorder %v43_v4, %v40_v3  ;;  %vm77_vm8 = vcmp.eq.s32.totalorder %v40_v3, 0 }
   0x5   :  { %vm51_vm3 = vmand %vm50_vm2, %vm41_vm1  ;;  %vm74_vm9 = vcmp.eq.s32.totalorder %v40_v3, %v43_v4  ;;  %v78_v21 = vsel %vm77_vm8, 1.0, %v178_v20  ;;  %vm85_vm10 = vcmp.eq.s32.totalorder %v40_v3, 1  ;;  %vm95_vm11 = vcmp.eq.s32.totalorder %v40_v3, 2 }
   0x6   :  { %v79_v22 = vsel %vm74_vm9, %v78_v21, 0.0  ;;  %vm105_vm12 = vcmp.eq.s32.totalorder %v40_v3, 3 }
   0x9   :  { %v37_v2 = vld [vmem:[#allocation1] sm:$0xf] }
   0xa   :  { %38 = vst [vmem:[#allocation0] sm:$0xf] %v37_v2 }
  0x11   :  { %v46_v5 = vld [vmem:[#allocation0] sm:$0xff] }
  0x12   :  { %v47_v6 = vsel %vm45_vm0, %v46_v5, 0.0  ;;  %v52_v15 = vsel %vm51_vm3, %v46_v5, 0.0 }
  0x13   :  { %48 = vadd.xlane.f32.xlu0 %v47_v6 }
  0x86   :  { %v49_v7 = vpop.xlane.xlu0 %48 }
  0x87   :  { %176 = vrcp.f32 %v49_v7  ;;  %v64_v11 = vand.u32 2147483648, %v49_v7  ;;  %v62_v13 = vand.u32 2147483647, %v49_v7  ;;  %vm58_vm5 = vweird.f32 %v49_v7 }
  0x89   :  { %v65_v16 = vor.u32 1.1754944e-38, %v64_v11  ;;  %vm63_vm7 = vcmp.eq.f32.partialorder %v62_v13, 8.507059e+37 }
  0x8d   :  { %v177_v8 = vpop.eup %176 }
  0x8e   :  { %v54_v9 = vmul.f32 %v177_v8, %v49_v7  ;;  %vm59_vm4 = vweird.f32 %v177_v8 }
  0x8f   :  { %vm60_vm6 = vmor %vm58_vm5, %vm59_vm4 }
  0x90   :  { %v55_v10 = vsub.f32 1.0, %v54_v9 }
  0x92   :  { %v56_v12 = vmul.f32 %v177_v8, %v55_v10 }
  0x94   :  { %v57_v14 = vadd.f32 %v177_v8, %v56_v12 }
  0x96   :  { %v61_v17 = vsel %vm60_vm6, %v177_v8, %v57_v14 }
  0x97   :  { %v66_v18 = vsel %vm63_vm7, %v65_v16, %v61_v17 }
  0x98   :  { %v67_v19 = vmul.f32 %v66_v18, %v52_v15 }
  0x9a   :  { %68 = vst [vmem:[#allocation4] sm:$0xff] %v67_v19 }
  0xa1   :  { %v81_v23 = vld [vmem:[#allocation4 + $0x1] ss:$0 sm:$0xff]  ;;  %v91_v26 = vld [vmem:[#allocation4 + $0x2] ss:$0 sm:$0xff]  ;;  %v101_v31 = vld [vmem:[#allocation4 + $0x3] ss:$0 sm:$0xff] }
  0xa2   :  { %v82_v24 = vxor.u32 2147483648, %v81_v23  ;;  %v92_v28 = vxor.u32 2147483648, %v91_v26  ;;  %v102_v33 = vxor.u32 2147483648, %v101_v31 }
  0xa4   :  { %v86_v25 = vmul.f32 %v82_v24, %v79_v22 }
  0xa6   :  { %87 = vadd.xlane.f32.xlu0 %v86_v25 }
 0x119   :  { %v88_v27 = vpop.xlane.xlu0 %87 }
 0x11a   :  { %v89_v29 = vsel %vm85_vm10, %v88_v27, %v79_v22 }
 0x11b   :  { %v96_v30 = vmul.f32 %v92_v28, %v89_v29 }
 0x11d   :  { %97 = vadd.xlane.f32.xlu1 %v96_v30 }
 0x190   :  { %v98_v32 = vpop.xlane.xlu1 %97 }
 0x191   :  { %v99_v34 = vsel %vm95_vm11, %v98_v32, %v89_v29 }
 0x192   :  { %v106_v35 = vmul.f32 %v102_v33, %v99_v34 }
 0x194   :  { %107 = vadd.xlane.f32.xlu1 %v106_v35 }
 0x207   :  { %v108_v36 = vpop.xlane.xlu1 %107 }
 0x208   :  { %v109_v37 = vsel %vm105_vm12, %v108_v36, %v99_v34 }
 0x209   :  { %v124_v38 = vmul.f32 %v109_v37, %v66_v18 }
 0x20b   :  { %v126_v39 = vsel %vm58_vm5, %v109_v37, %v124_v38 }
 0x20c   :  { %127 = vst [vmem:[#allocation2] sm:$0xff] %v126_v39 }
 0x213   :  { %v130_v40 = vld [vmem:[#allocation2] sm:$0xf] }
 0x214   :  { %133 = vst [vmem:[#allocation3] sm:$0xf] %v130_v40 }
 0x21b   :  { %v150_v41 = vld [vmem:[#allocation3] sm:$0xf] }
 0x21c   :  { %151 = vst [vmem:[%s198_s1] sm:$0xf] %v150_v41 }

// kernel: inverse_1x1_conv.1
= control target key start
LH: loop header
LB: loop body
LE: loop exit
PB: predicated region body
PF: predicated region fallthrough
CT: control target
= control target key end

     0   :  { %7 = vsyncpa [#allocation3], 0  ;;  %s504_s9 = smov 0   ;;  %s506_s10 = smov 0   ;;  %s559_s0 = inlined_call_operand.vmem [shape: f32[4,4], index: 0, kind: input, shape index: {}]   ;;  %s560_s1 = inlined_call_operand.vmem [shape: f32[2,4,256], index: 1, kind: input, shape index: {}]   ;;  %s561_s2 = inlined_call_operand.vmem [shape: f32[2,4,256], index: 2, kind: output, shape index: {}]  }
   0x1   :  { %s508_s11 = smov 0  }
   0x2 LB: > { %s374_s12 = sadd.s32 4294967295, %s486_s11   ;;  %s25_s13 = sadd.s32 1, %s482_s10  ;;  %s486_s11 = sphi %s508_s11, %s13_s11   ;;  %s482_s10 = sphi %s506_s10, %s565_s10   ;;  %s478_s9 = sphi %s504_s9, %s564_s9  }
   0x3   : > { %p27_p0 = scmp.ge.s32.totalorder %s25_s13, 2  ;;  %p376_p1 = scmp.ge.s32.totalorder %s486_s11, 1 }
   0x4   : > { %p107_p2 = scmp.lt.s32.totalorder %s486_s11, 3  ;;  %p418_p4 = scmp.eq.s32.totalorder %s374_s12, 0 }
   0x5   : > { %s567_s13 = smov (%p27_p0, %s25_s13), 0  ;;  %s119_s16 = sshll.u32 %s559_s0, 4  ;;  %s120_s16 = int_to_ptr.vmem [resolvable:$true] %s119_s16 }
   0x6   : > { %p108_p3 = pnand %p376_p1, %p107_p2  ;;  %s488_s17 = smov [#allocation2]  }
   0x8   : > { %p414_p5 = pneg %p108_p3  ;;  %145 = sbr.rel (%p108_p3) target bundleno = 47 (0x2f), region = 28 }
   0xa   : > { %p415_p6 = pnand %p418_p4, %p414_p5 }
   0xc   : > { %417 = dma.vmem_to_smem (!%p415_p6), %s120_s16, 64, %s488_s17, [#allocation3]  }
   0xd   : > { %473 = dma.done.wait (%p418_p4), [#allocation3], 64  }
   0xe   : > { %475 = vsyncadd (%p418_p4), [#allocation3], 4294967232 }
   0xf   : > { %152 = sfence }
  0x10   : > { %p178_p7 = scmp.lt.s32.totalorder %s478_s9, 1  ;;  %s204_s18 = sld [smem:[#allocation2]]  ;;  %v219_v9 = vlaneseq }
  0x11   : > { %s388_s19 = sld [smem:[#allocation2 + $0x1]] }
  0x12   : > { %s569_s9 = smov (!%p178_p7, %s478_s9), 1  ;;  %s389_s20 = sld [smem:[#allocation2 + $0x2]]  ;;  %vm534_vm0 = vcmp.lt.s32.totalorder %v219_v9, 256 }
  0x13   : > { %s408_s21 = sshll.u32 %s569_s9, 3  ;;  %s390_s22 = sld [smem:[#allocation2 + $0x3]] }
  0x14   : > { %s185_s25 = scalar_lea.vmem %s560_s1, %s408_s21  ;;  %s391_s26 = sld [smem:[#allocation2 + $0x80]] }
  0x15   : > { %v197_v0 = vld [vmem:[%s185_s25] ss:$4 sm:$0x3]  ;;  %v385_v1 = vld [vmem:[%s185_s25 + $0x1] ss:$4 sm:$0x3]  ;;  %s532_s5 = scalar_lea.vmem %s561_s2, %s408_s21 }
  0x16   : > { %v205_v2 = vstv %s204_s18  ;;  %v386_v3 = vld [vmem:[%s185_s25 + $0x2] ss:$4 sm:$0x3]  ;;  %v387_v6 = vld [vmem:[%s185_s25 + $0x3] ss:$4 sm:$0x3] }
  0x17   : > { %v206_v4 = vmul.f32 %v205_v2, %v197_v0  ;;  %v208_v5 = vstv %s388_s19  ;;  %s392_s27 = sld [smem:[#allocation2 + $0x81]] }
  0x18   : > { %v209_v7 = vmul.f32 %v385_v1, %v208_v5  ;;  %v212_v8 = vstv %s389_s20  ;;  %s393_s28 = sld [smem:[#allocation2 + $0x82]] }
  0x19   : > { %v213_v11 = vmul.f32 %v386_v3, %v212_v8  ;;  %v216_v12 = vstv %s390_s22  ;;  %s394_s29 = sld [smem:[#allocation2 + $0x83]] }
  0x1a   : > { %v210_v10 = vadd.f32 %v209_v7, %v206_v4  ;;  %v217_v13 = vmul.f32 %v387_v6, %v216_v12  ;;  %s396_s30 = sld [smem:[#allocation2 + $0x100]]  ;;  %v225_v17 = vstv %s391_s26 }
  0x1b   : > { %s397_s6 = sld [smem:[#allocation2 + $0x101]]  ;;  %v226_v18 = vmul.f32 %v225_v17, %v197_v0 }
  0x1c   : > { %v214_v14 = vadd.f32 %v213_v11, %v210_v10  ;;  %s398_s7 = sld [smem:[#allocation2 + $0x102]] }
  0x1d   : > { %v228_v19 = vstv %s392_s27  ;;  %s399_s8 = sld [smem:[#allocation2 + $0x103]] }
  0x1e   : > { %v218_v16 = vadd.f32 %v217_v13, %v214_v14  ;;  %v229_v20 = vmul.f32 %v385_v1, %v228_v19  ;;  %v232_v21 = vstv %s393_s28  ;;  %s401_s9 = sld [smem:[#allocation2 + $0x180]] }
  0x1f   : > { %v233_v22 = vmul.f32 %v386_v3, %v232_v21  ;;  %v236_v23 = vstv %s394_s29  ;;  %s402_s12 = sld [smem:[#allocation2 + $0x181]] }
  0x20   : > { %223 = vst.msk [vmem:[%s532_s5] ss:$4 sm:$0x3] %vm534_vm0, %v218_v16  ;;  %v230_v24 = vadd.f32 %v229_v20, %v226_v18  ;;  %v237_v25 = vmul.f32 %v387_v6, %v236_v23  ;;  %v242_v26 = vstv %s396_s30  ;;  %s403_s14 = sld [smem:[#allocation2 + $0x182]] }
  0x21   : > { %v243_v27 = vmul.f32 %v242_v26, %v197_v0  ;;  %v245_v28 = vstv %s397_s6  ;;  %s404_s15 = sld [smem:[#allocation2 + $0x183]] }
  0x22   : > { %v234_v29 = vadd.f32 %v233_v22, %v230_v24  ;;  %v246_v30 = vmul.f32 %v385_v1, %v245_v28  ;;  %v249_v31 = vstv %s398_s7 }
  0x23   : > { %v250_v32 = vmul.f32 %v386_v3, %v249_v31  ;;  %v253_v33 = vstv %s399_s8 }
  0x24   : > { %v238_v34 = vadd.f32 %v237_v25, %v234_v29  ;;  %v247_v35 = vadd.f32 %v246_v30, %v243_v27  ;;  %v254_v36 = vmul.f32 %v387_v6, %v253_v33  ;;  %v259_v37 = vstv %s401_s9 }
  0x25   : > { %v260_v38 = vmul.f32 %v259_v37, %v197_v0  ;;  %v262_v39 = vstv %s402_s12 }
  0x26   : > { %395 = vst.msk [vmem:[%s532_s5 + $0x1] ss:$4 sm:$0x3] %vm534_vm0, %v238_v34  ;;  %v251_v40 = vadd.f32 %v250_v32, %v247_v35  ;;  %v263_v41 = vmul.f32 %v385_v1, %v262_v39  ;;  %v266_v42 = vstv %s403_s14 }
  0x27   : > { %v267_v43 = vmul.f32 %v386_v3, %v266_v42  ;;  %v270_v44 = vstv %s404_s15 }
  0x28   : > { %v255_v45 = vadd.f32 %v254_v36, %v251_v40  ;;  %v264_v46 = vadd.f32 %v263_v41, %v260_v38  ;;  %v271_v47 = vmul.f32 %v387_v6, %v270_v44 }
  0x2a   : > { %400 = vst.msk [vmem:[%s532_s5 + $0x2] ss:$4 sm:$0x3] %vm534_vm0, %v255_v45  ;;  %v268_v48 = vadd.f32 %v267_v43, %v264_v46 }
  0x2c   : > { %v272_v49 = vadd.f32 %v271_v47, %v268_v48 }
  0x2e   : > { %405 = vst.msk [vmem:[%s532_s5 + $0x3] ss:$4 sm:$0x3] %vm534_vm0, %v272_v49 }
  0x2f PF: > { %s13_s11 = sadd.s32 1, %s486_s11   ;;  %s564_s9 = smov %s482_s10 }
  0x30   : > { %p10_p8 = scmp.ge.s32.totalorder %s13_s11, 4   ;;  %s565_s10 = smov %s567_s13 }
  0x32   :  { %12 = sbr.rel (!%p10_p8) target bundleno = 2 (0x2), region = 69 }
  0x37   :  { %305 = vsyncpa [#allocation3], 1 }
  0x38   :  { %307 = vsyncpa [#allocation3 + $0x1], 1 }

</bundles_post_ra>
